<compile_context>
chip_gen: v7x
topology: tpu7x:2x2x1
jax: 0.10.0
libtpu: 0.0.40
codegen_flags: <defaults>
</compile_context>

<pallas_src>
import jax
import jax.numpy as jnp
from jax import lax
from jax.experimental import pallas as pl
from jax.experimental.pallas import tpu as pltpu

_LANES = 128
_PRED_PAD = -1e30  # sigmoid(_PRED_PAD) == 0.0 exactly (also maps to -inf in f16)
_TARGET_BLOCK_BYTES = 4 * 1024 * 1024  # per-input block; 2 in x 2 buf = 16 MiB
_VMEM_LIMIT_BYTES = 32 * 1024 * 1024   # safe scoped-VMEM budget on v5e/v6e/v7x


def _make_dice_kernel(rows_valid, tile_rows, needs_row_mask):
    """Kernel specialized (at trace time) on static row counts / masking."""

    def kernel(pred_ref, targ_ref, inter_ref, den_ref):
        # Grid: (batch tile [parallel], feature tile [arbitrary / reduction]).
        k = pl.program_id(1)

        @pl.when(k == 0)
        def _():
            inter_ref[...] = jnp.zeros_like(inter_ref)
            den_ref[...] = jnp.zeros_like(den_ref)

        # f32 accumulation regardless of the streaming dtype.
        p = jax.nn.sigmoid(pred_ref[...].astype(jnp.float32))  # (tn, tr, 128)
        t = targ_ref[...].astype(jnp.float32)

        prod = p * t
        both = p + t  # fused denominator: sum(sigmoid(pred)) + sum(target)

        if needs_row_mask:
            # Last feature tile overhangs the array; mask the garbage rows.
            local = lax.broadcasted_iota(jnp.int32, p.shape, 1)
            valid = (k * tile_rows + local) < rows_valid
            prod = jnp.where(valid, prod, 0.0)
            both = jnp.where(valid, both, 0.0)

        # Reduce only over the row (sublane-major) axis; lanes stay dense.
        inter_ref[...] += jnp.sum(prod, axis=1)  # (tile_n, 128)
        den_ref[...] += jnp.sum(both, axis=1)    # (tile_n, 128)

    return kernel


def dice_loss(pred, target):
    """Replicates DiceLoss.forward(pred, target) from the PyTorch module."""
    assert pred.shape == target.shape
    n = int(pred.shape[0])
    d = 1
    for s in pred.shape[1:]:
        d *= int(s)

    p_bytes = int(jnp.dtype(pred.dtype).itemsize)
    t_bytes = int(jnp.dtype(target.dtype).itemsize)
    max_bytes = max(p_bytes, t_bytes)
    # Sublane packing: second-minor block dim must be a multiple of 8 (4-byte),
    # 16 (2-byte), 32 (1-byte) elements.
    sub = max(8, 32 // min(p_bytes, t_bytes))

    rows = -(-d // _LANES)          # ceil(d / 128)
    d_pad = rows * _LANES           # minimal lane padding only (<= 127 elems)

    # NOTE: no dtype cast here — avoids an extra full HBM read+write pass.
    pred_flat = pred.reshape(n, d)
    targ_flat = target.reshape(n, d)
    if d_pad != d:
        # Padding contributes exactly 0 to every sum: sigmoid(-1e30)==0, t==0.
        pad = d_pad - d
        pred_flat = jnp.pad(pred_flat, ((0, 0), (0, pad)),
                            constant_values=_PRED_PAD)
        targ_flat = jnp.pad(targ_flat, ((0, 0), (0, pad)),
                            constant_values=0.0)

    pred3 = pred_flat.reshape(n, rows, _LANES)
    targ3 = targ_flat.reshape(n, rows, _LANES)

    # Batch tiling: one block for small N, else 8-row batch tiles so block
    # size (and VMEM footprint) is decoupled from N.
    tile_n = n if n <= 8 else 8
    num_b = pl.cdiv(n, tile_n)

    # Feature (row) tiling: ~_TARGET_BLOCK_BYTES per input block, multiple of
    # `sub`, never exceeding the array so the last tile (if any) only
    # overhangs by < tile_rows rows (masked in-kernel).
    if rows <= sub:
        tile_rows = rows            # equals full dim -> allowed even if < 8
    else:
        t = _TARGET_BLOCK_BYTES // (tile_n * _LANES * max_bytes)
        t = max(sub, (t // sub) * sub)
        tile_rows = min(t, (rows // sub) * sub)
    num_k = pl.cdiv(rows, tile_rows)
    needs_row_mask = (rows % tile_rows) != 0

    kernel = _make_dice_kernel(rows, tile_rows, needs_row_mask)

    in_map = lambda b, k: (b, k, 0)
    out_map = lambda b, k: (b, 0)

    cost = pl.CostEstimate(
        flops=5 * n * d,                                   # mul + adds per elem
        transcendentals=n * d,                             # sigmoid
        bytes_accessed=n * d_pad * (p_bytes + t_bytes) + 2 * n * _LANES * 4,
    )

    # TODO(synk): on v7x (2 TensorCores/chip) add a leading CORE_PARALLEL grid
    # axis (or pl.core_map over pltpu.create_tensorcore_mesh) to use both
    # cores; plain "parallel" does not shard across cores and a split axis is
    # pure overhead on 1-TC v5e/v6e.
    inter, den = pl.pallas_call(
        kernel,
        out_shape=(
            jax.ShapeDtypeStruct((n, _LANES), jnp.float32),
            jax.ShapeDtypeStruct((n, _LANES), jnp.float32),
        ),
        grid_spec=pltpu.PrefetchScalarGridSpec(
            num_scalar_prefetch=0,
            grid=(num_b, num_k),
            in_specs=[
                pl.BlockSpec((tile_n, tile_rows, _LANES), in_map),
                pl.BlockSpec((tile_n, tile_rows, _LANES), in_map),
            ],
            out_specs=(
                pl.BlockSpec((tile_n, _LANES), out_map),
                pl.BlockSpec((tile_n, _LANES), out_map),
            ),
        ),
        compiler_params=pltpu.CompilerParams(
            dimension_semantics=("parallel", "arbitrary"),
            vmem_limit_bytes=_VMEM_LIMIT_BYTES,
        ),
        cost_estimate=cost,
    )(pred3, targ3)

    # Tiny epilogue in plain JAX: one cross-lane reduce + scalar math.
    inter_s = jnp.sum(inter, axis=1)  # (n,)
    den_s = jnp.sum(den, axis=1)      # (n,)
    smooth = 1e-6                     # matches the PyTorch module exactly
    dice = (2.0 * inter_s + smooth) / (den_s + smooth)
    return 1.0 - jnp.mean(dice)


def _reference_dice_loss(pred, target):
    p = jax.nn.sigmoid(pred.astype(jnp.float32))
    t = target.astype(jnp.float32)
    smooth = 1e-6
    inter = jnp.sum(p * t, axis=(1, 2, 3))
    dice = (2.0 * inter + smooth) / (
        jnp.sum(p, axis=(1, 2, 3)) + jnp.sum(t, axis=(1, 2, 3)) + smooth
    )
    return 1.0 - jnp.mean(dice)


if __name__ == "__main__":
    key = jax.random.PRNGKey(0)
    k1, k2 = jax.random.split(key)
    # Small NCHW shapes: batch=2, channels=4, spatial=16x16.
    pred = jax.random.normal(k1, (2, 4, 16, 16), dtype=jnp.float32)
    target = (jax.random.uniform(k2, (2, 4, 16, 16)) > 0.5).astype(jnp.float32)

    loss = jax.block_until_ready(jax.jit(dice_loss)(pred, target))
    ref = jax.block_until_ready(_reference_dice_loss(pred, target))

    assert jnp.allclose(loss, ref, atol=1e-5, rtol=1e-5), (loss, ref)
    print("KERNEL_OK")
</pallas_src>

<mosaic_0001>
module attributes {stable_mosaic.version = 11 : i64} {
  func.func @kernel(%arg0: i32, %arg1: i32, %arg2: memref<2x8x128xf32, #tpu.memory_space<vmem>>, %arg3: memref<2x8x128xf32, #tpu.memory_space<vmem>>, %arg4: memref<2x128xf32, #tpu.memory_space<vmem>>, %arg5: memref<2x128xf32, #tpu.memory_space<vmem>>) attributes {dimension_semantics = [#tpu.dimension_semantics<parallel>, #tpu.dimension_semantics<arbitrary>], iteration_bounds = array<i64: 1, 1>, scalar_prefetch = 0 : i64, scratch_operands = 0 : i64, tpu.core_type = #tpu.core_type<tc>, window_params = [{transform_indices = @transform_0, window_bounds = array<i64: 2, 8, 128>}, {transform_indices = @transform_1, window_bounds = array<i64: 2, 8, 128>}, {transform_indices = @transform_2, window_bounds = array<i64: 2, 128>}, {transform_indices = @transform_3, window_bounds = array<i64: 2, 128>}]} {
    %c0_i32 = arith.constant 0 : i32
    %0 = arith.cmpi eq, %arg1, %c0_i32 : i32
    %1 = arith.extui %0 : i1 to i32
    %c0_i32_0 = arith.constant 0 : i32
    %2 = arith.cmpi ne, %1, %c0_i32_0 : i32
    scf.if %2 {
      %cst_16 = arith.constant 0.000000e+00 : f32
      %20 = vector.broadcast %cst_16 : f32 to vector<2x128xf32>
      %c0_17 = arith.constant 0 : index
      %c0_18 = arith.constant 0 : index
      %21 = vector.load %arg4[%c0_17, %c0_18] : memref<2x128xf32, #tpu.memory_space<vmem>>, vector<2x128xf32>
      tpu.vector_store %arg4[%c0_17, %c0_18], %20 {strides = array<i32>} : memref<2x128xf32, #tpu.memory_space<vmem>>, vector<2x128xf32>,
      %cst_19 = arith.constant 0.000000e+00 : f32
      %22 = vector.broadcast %cst_19 : f32 to vector<2x128xf32>
      %c0_20 = arith.constant 0 : index
      %c0_21 = arith.constant 0 : index
      %23 = vector.load %arg5[%c0_20, %c0_21] : memref<2x128xf32, #tpu.memory_space<vmem>>, vector<2x128xf32>
      tpu.vector_store %arg5[%c0_20, %c0_21], %22 {strides = array<i32>} : memref<2x128xf32, #tpu.memory_space<vmem>>, vector<2x128xf32>,
    } else {
    }
    %c0 = arith.constant 0 : index
    %c0_1 = arith.constant 0 : index
    %c0_2 = arith.constant 0 : index
    %3 = vector.load %arg2[%c0, %c0_1, %c0_2] : memref<2x8x128xf32, #tpu.memory_space<vmem>>, vector<2x8x128xf32>
    %4 = arith.negf %3 : vector<2x8x128xf32>
    %5 = math.exp %4 : vector<2x8x128xf32>
    %cst = arith.constant 1.000000e+00 : f32
    %6 = vector.broadcast %cst : f32 to vector<2x8x128xf32>
    %7 = arith.addf %6, %5 : vector<2x8x128xf32>
    %8 = arith.divf %6, %7 : vector<2x8x128xf32>
    %c0_3 = arith.constant 0 : index
    %c0_4 = arith.constant 0 : index
    %c0_5 = arith.constant 0 : index
    %9 = vector.load %arg3[%c0_3, %c0_4, %c0_5] : memref<2x8x128xf32, #tpu.memory_space<vmem>>, vector<2x8x128xf32>
    %10 = arith.mulf %8, %9 : vector<2x8x128xf32>
    %11 = arith.addf %8, %9 : vector<2x8x128xf32>
    %c0_6 = arith.constant 0 : index
    %c0_7 = arith.constant 0 : index
    %12 = vector.load %arg4[%c0_6, %c0_7] : memref<2x128xf32, #tpu.memory_space<vmem>>, vector<2x128xf32>
    %cst_8 = arith.constant dense<0.000000e+00> : vector<2x128xf32>
    %13 = vector.multi_reduction <add>, %10, %cst_8 [1] : vector<2x8x128xf32> to vector<2x128xf32>
    %14 = arith.addf %12, %13 : vector<2x128xf32>
    %c0_9 = arith.constant 0 : index
    %c0_10 = arith.constant 0 : index
    %15 = vector.load %arg4[%c0_9, %c0_10] : memref<2x128xf32, #tpu.memory_space<vmem>>, vector<2x128xf32>
    tpu.vector_store %arg4[%c0_9, %c0_10], %14 {strides = array<i32>} : memref<2x128xf32, #tpu.memory_space<vmem>>, vector<2x128xf32>,
    %c0_11 = arith.constant 0 : index
    %c0_12 = arith.constant 0 : index
    %16 = vector.load %arg5[%c0_11, %c0_12] : memref<2x128xf32, #tpu.memory_space<vmem>>, vector<2x128xf32>
    %cst_13 = arith.constant dense<0.000000e+00> : vector<2x128xf32>
    %17 = vector.multi_reduction <add>, %11, %cst_13 [1] : vector<2x8x128xf32> to vector<2x128xf32>
    %18 = arith.addf %16, %17 : vector<2x128xf32>
    %c0_14 = arith.constant 0 : index
    %c0_15 = arith.constant 0 : index
    %19 = vector.load %arg5[%c0_14, %c0_15] : memref<2x128xf32, #tpu.memory_space<vmem>>, vector<2x128xf32>
    tpu.vector_store %arg5[%c0_14, %c0_15], %18 {strides = array<i32>} : memref<2x128xf32, #tpu.memory_space<vmem>>, vector<2x128xf32>,
    return
  }
  func.func @transform_0(%arg0: i32, %arg1: i32) -> (i32, i32, i32) {
    %c0_i32 = arith.constant 0 : i32
    %c0_i32_0 = arith.constant 0 : i32
    return %arg0, %arg1, %c0_i32 : i32, i32, i32
  }
  func.func @transform_1(%arg0: i32, %arg1: i32) -> (i32, i32, i32) {
    %c0_i32 = arith.constant 0 : i32
    %c0_i32_0 = arith.constant 0 : i32
    return %arg0, %arg1, %c0_i32 : i32, i32, i32
  }
  func.func @transform_2(%arg0: i32, %arg1: i32) -> (i32, i32) {
    %c0_i32 = arith.constant 0 : i32
    %c0_i32_0 = arith.constant 0 : i32
    return %arg0, %c0_i32 : i32, i32
  }
  func.func @transform_3(%arg0: i32, %arg1: i32) -> (i32, i32) {
    %c0_i32 = arith.constant 0 : i32
    %c0_i32_0 = arith.constant 0 : i32
    return %arg0, %c0_i32 : i32, i32
  }
}

</mosaic_0001>

<bundles_post_ra>
// kernel: dice_loss.1
= control target key start
LH: loop header
LB: loop body
LE: loop exit
PB: predicated region body
PF: predicated region fallthrough
CT: control target
= control target key end

     0   :  { %v97_v0 = vmov 0.0   ;;  %vm54_vm0 = vcmask 1041409   ;;  %s148_s2 = inlined_call_operand.vmem [shape: f32[2,128], index: 2, kind: output, shape index: {0}]   ;;  %s149_s3 = inlined_call_operand.vmem [shape: f32[2,128], index: 3, kind: output, shape index: {1}]   ;;  %s150_s0 = inlined_call_operand.vmem [shape: f32[2,8,128], index: 0, kind: input, shape index: {}]   ;;  %s151_s1 = inlined_call_operand.vmem [shape: f32[2,8,128], index: 1, kind: input, shape index: {}]  }
   0x1   :  { %17 = vst [vmem:[%s148_s2] sm:$0x3] %v97_v0  ;;  %18 = vst [vmem:[%s149_s3] sm:$0x3] %v97_v0  ;;  %v19_v1 = vld [vmem:[%s150_s0] sm:$0xff]  ;;  %v20_v2 = vld [vmem:[%s150_s0 + $0x8] sm:$0xff] }
   0x2   :  { %v86_v3 = vmul.f32 -1.442695, %v19_v1  ;;  %v87_v4 = vmul.f32 -1.442695, %v20_v2  ;;  %v33_v9 = vld [vmem:[%s151_s1] sm:$0xff]  ;;  %v34_v10 = vld [vmem:[%s151_s1 + $0x8] sm:$0xff] }
   0x4   :  { %89 = vpow2.f32 %v86_v3 }
   0x5   :  { %91 = vpow2.f32 %v87_v4 }
   0x8   :  { %v39_v39 = vld [vmem:[%s148_s2] sm:$0x3] }
   0x9   :  { %v59_v41 = vld [vmem:[%s149_s3] sm:$0x3] }
   0xe   :  { %v90_v5 = vpop.eup %89 }
   0xf   :  { %v92_v6 = vpop.eup %91  ;;  %v27_v7 = vadd.f32 1.0, %v90_v5 }
  0x10   :  { %v28_v8 = vadd.f32 1.0, %v92_v6 }
  0x11   :  { %93 = vrcp.f32 %v27_v7 }
  0x12   :  { %95 = vrcp.f32 %v28_v8 }
  0x1b   :  { %v94_v11 = vpop.eup %93 }
  0x1c   :  { %v96_v12 = vpop.eup %95  ;;  %v35_v13 = vmul.f32 %v94_v11, %v33_v9  ;;  %v37_v14 = vadd.f32 %v94_v11, %v33_v9 }
  0x1d   :  { %v36_v15 = vmul.f32 %v96_v12, %v34_v10  ;;  %v38_v16 = vadd.f32 %v96_v12, %v34_v10 }
  0x1e   :  { %v40_v17 = vrot.slane %v35_v13, 4  ;;  %v60_v18 = vrot.slane %v37_v14, 4 }
  0x1f   :  { %v46_v19 = vrot.slane %v36_v15, 4  ;;  %v66_v20 = vrot.slane %v38_v16, 4 }
  0x20   :  { %v41_v21 = vadd.f32 %v40_v17, %v35_v13  ;;  %v61_v22 = vadd.f32 %v60_v18, %v37_v14 }
  0x21   :  { %v47_v23 = vadd.f32 %v46_v19, %v36_v15  ;;  %v67_v24 = vadd.f32 %v66_v20, %v38_v16 }
  0x22   :  { %v42_v25 = vrot.slane %v41_v21, 2  ;;  %v62_v26 = vrot.slane %v61_v22, 2 }
  0x23   :  { %v48_v27 = vrot.slane %v47_v23, 2  ;;  %v68_v28 = vrot.slane %v67_v24, 2 }
  0x24   :  { %v43_v29 = vadd.f32 %v42_v25, %v41_v21  ;;  %v63_v30 = vadd.f32 %v62_v26, %v61_v22 }
  0x25   :  { %v49_v31 = vadd.f32 %v48_v27, %v47_v23  ;;  %v69_v32 = vadd.f32 %v68_v28, %v67_v24 }
  0x26   :  { %v44_v33 = vrot.slane %v43_v29, 1  ;;  %v64_v34 = vrot.slane %v63_v30, 1 }
  0x27   :  { %v50_v35 = vrot.slane %v49_v31, 1  ;;  %v70_v36 = vrot.slane %v69_v32, 1 }
  0x28   :  { %v45_v37 = vadd.f32 %v44_v33, %v43_v29  ;;  %v65_v38 = vadd.f32 %v64_v34, %v63_v30 }
  0x29   :  { %v51_v40 = vadd.f32 %v50_v35, %v49_v31  ;;  %v71_v42 = vadd.f32 %v70_v36, %v69_v32 }
  0x2b   :  { %v55_v43 = vsel %vm54_vm0, %v51_v40, %v45_v37  ;;  %v74_v44 = vsel %vm54_vm0, %v71_v42, %v65_v38 }
  0x2c   :  { %v57_v45 = vadd.f32 %v55_v43, %v39_v39  ;;  %v76_v46 = vadd.f32 %v74_v44, %v59_v41 }
  0x2e   :  { %58 = vst [vmem:[%s148_s2] sm:$0x3] %v57_v45  ;;  %77 = vst [vmem:[%s149_s3] sm:$0x3] %v76_v46 }

</bundles_post_ra>
